<compile_context>
chip_gen: v6e
topology: v6e:2x2x1
jax: 0.10.0
libtpu: 0.0.40
codegen_flags: <defaults>
</compile_context>

<pallas_src>
import jax
import jax.numpy as jnp
from jax import lax
from jax.experimental import pallas as pl
from jax.experimental.pallas import tpu as pltpu


K_PAD = 128   # im2col K (= 9*Cin) padded to one full MXU lane group
N_PAD = 128   # Cout padded to 128 so output stores are lane-dense (no vst.msk)


def _conv_matmul_kernel(lhs_ref, w_ref, b_ref, o_ref):
    """One fused im2col matmul tile.

    lhs_ref: (1, TM, K_PAD)  bf16  -- TM pixels x (9*Cin, zero-padded) taps
    w_ref:   (K_PAD, N_PAD)  bf16  -- packed conv weights (zero-padded)
    b_ref:   (1, N_PAD)      f32   -- bias (zero-padded)
    o_ref:   (1, TM, N_PAD)  f32   -- lane-dense output tile
    """
    acc = jnp.dot(lhs_ref[0], w_ref[...], preferred_element_type=jnp.float32)
    o_ref[0] = (acc + b_ref[...]).astype(o_ref.dtype)


def _pick_pixel_tile(m):
    for tm in (512, 256, 128, 64, 32, 16, 8):
        if m % tm == 0:
            return tm
    return m  # block == full extent (always legal)


def _im2col_pack(x_nchw):
    """(B, Cin, H, W) f32 -> (B, H*W, K_PAD) bf16 im2col LHS, (ky,kx,cin)-major."""
    B, Cin, H, W = x_nchw.shape
    xp = jnp.pad(x_nchw, ((0, 0), (0, 0), (1, 1), (1, 1)))
    taps = [xp[:, :, ky:ky + H, kx:kx + W]
            for ky in range(3) for kx in range(3)]        # 9 x (B, Cin, H, W)
    patches = jnp.stack(taps, axis=1)                     # (B, 9, Cin, H, W)
    patches = jnp.transpose(patches, (0, 3, 4, 1, 2))     # (B, H, W, 9, Cin)
    lhs = patches.reshape(B, H * W, 9 * Cin)
    lhs = jnp.pad(lhs, ((0, 0), (0, 0), (0, K_PAD - 9 * Cin)))
    return lhs.astype(jnp.bfloat16)


def conv3x3_same_nchw(x_nchw, w_packed, b_packed, cout):
    """3x3 same-padding conv, NCHW in / NCHW out, single-matmul Pallas kernel."""
    B, _, H, W = x_nchw.shape
    M = H * W
    TM = _pick_pixel_tile(M)
    lhs = _im2col_pack(x_nchw)

    flops = 2 * B * M * K_PAD * N_PAD
    bytes_accessed = (lhs.size * 2 + int(w_packed.size) * 2
                      + int(b_packed.size) * 4 + B * M * N_PAD * 4)

    out = pl.pallas_call(
        _conv_matmul_kernel,
        out_shape=jax.ShapeDtypeStruct((B, M, N_PAD), jnp.float32),
        grid=(B, M // TM),
        in_specs=[
            pl.BlockSpec((1, TM, K_PAD), lambda b, m: (b, m, 0)),
            pl.BlockSpec((K_PAD, N_PAD), lambda b, m: (0, 0)),
            pl.BlockSpec((1, N_PAD), lambda b, m: (0, 0)),
        ],
        out_specs=pl.BlockSpec((1, TM, N_PAD), lambda b, m: (b, m, 0)),
        compiler_params=pltpu.CompilerParams(
            dimension_semantics=("parallel", "parallel"),
            vmem_limit_bytes=32 * 1024 * 1024),
        cost_estimate=pl.CostEstimate(
            flops=flops, transcendentals=0, bytes_accessed=bytes_accessed),
    )(lhs, w_packed, b_packed)

    # Drop the channel padding and return NCHW (nn.Conv2d convention).
    y = out[:, :, :cout].reshape(B, H, W, cout)
    return jnp.transpose(y, (0, 3, 1, 2))


class Model:
    """JAX/Pallas analogue of the PyTorch `Model` wrapper (inference path)."""

    def __init__(self, in_channels=4, hidden=32, scale=1, seed=0):
        self.scale = scale
        self.idx_scale = 0
        self.in_channels = in_channels
        self.hidden = hidden
        key = jax.random.PRNGKey(seed)
        kw, kb = jax.random.split(key)
        # Stand-in `conv_first` parameters (3x3, Cin -> hidden); f32 master copy.
        self.w = jax.random.normal(
            kw, (3, 3, in_channels, hidden), dtype=jnp.float32) * 0.05
        self.b = jax.random.normal(kb, (hidden,), dtype=jnp.float32) * 0.01
        # One-time repack: (3,3,Cin,Cout) -> (9*Cin, Cout), zero-padded to
        # (K_PAD, N_PAD) in bf16, so the kernel runs a single lane-dense matmul.
        k = 9 * in_channels
        w9 = self.w.reshape(k, hidden).astype(jnp.bfloat16)
        self.w_packed = jnp.zeros((K_PAD, N_PAD), jnp.bfloat16).at[:k, :hidden].set(w9)
        self.b_packed = jnp.zeros((1, N_PAD), jnp.float32).at[0, :hidden].set(self.b)

    def _model(self, x_nchw):
        return conv3x3_same_nchw(x_nchw, self.w_packed, self.b_packed, self.hidden)

    def forward(self, x, idx_scale):
        # proj_updater.redraw_projections() is training-time bookkeeping -> no-op.
        self.idx_scale = idx_scale
        # Default (non-chop) inference path: result = self.model(x).
        return self._model(x)

    def __call__(self, x, idx_scale):
        return self.forward(x, idx_scale)


if __name__ == "__main__":
    key = jax.random.PRNGKey(0)
    B, C, H, W = 2, 4, 16, 16
    x = jax.random.normal(key, (B, C, H, W), dtype=jnp.float32)

    model = Model(in_channels=C, hidden=32, scale=1, seed=0)
    y = jax.block_until_ready(model(x, idx_scale=0))

    # Reference: plain-JAX conv with the SAME bf16-rounded inputs/weights
    # (the Pallas matmul runs in bf16 on the MXU with an f32 accumulator).
    x_bf = x.astype(jnp.bfloat16).astype(jnp.float32)
    w_bf = model.w.astype(jnp.bfloat16).astype(jnp.float32)
    ref = lax.conv_general_dilated(
        x_bf, jnp.transpose(w_bf, (3, 2, 0, 1)),          # OIHW
        window_strides=(1, 1), padding=((1, 1), (1, 1)),
        dimension_numbers=("NCHW", "OIHW", "NCHW"),
    ) + model.b.reshape(1, -1, 1, 1)

    assert y.shape == (B, 32, H, W)
    assert y.dtype == jnp.float32
    assert jnp.allclose(y, ref, atol=2e-3, rtol=2e-3), float(jnp.max(jnp.abs(y - ref)))

    print("KERNEL_OK")
</pallas_src>

<mosaic_0001>
module attributes {stable_mosaic.version = 11 : i64} {
  func.func @_conv_matmul_kernel(%arg0: i32, %arg1: i32, %arg2: memref<1x256x128xbf16, #tpu.memory_space<vmem>>, %arg3: memref<128x128xbf16, #tpu.memory_space<vmem>>, %arg4: memref<1x128xf32, #tpu.memory_space<vmem>>, %arg5: memref<1x256x128xf32, #tpu.memory_space<vmem>>) attributes {dimension_semantics = [#tpu.dimension_semantics<parallel>, #tpu.dimension_semantics<parallel>], iteration_bounds = array<i64: 2, 1>, scalar_prefetch = 0 : i64, scratch_operands = 0 : i64, tpu.core_type = #tpu.core_type<tc>, window_params = [{transform_indices = @transform_0, window_bounds = array<i64: 1, 256, 128>}, {pipeline_mode = #tpu.pipeline_mode<synchronous>, transform_indices = @transform_1, window_bounds = array<i64: 128, 128>}, {pipeline_mode = #tpu.pipeline_mode<synchronous>, transform_indices = @transform_2, window_bounds = array<i64: 1, 128>}, {transform_indices = @transform_3, window_bounds = array<i64: 1, 256, 128>}]} {
    %c0 = arith.constant 0 : index
    %c0_0 = arith.constant 0 : index
    %c0_1 = arith.constant 0 : index
    %0 = vector.load %arg2[%c0, %c0_0, %c0_1] : memref<1x256x128xbf16, #tpu.memory_space<vmem>>, vector<1x256x128xbf16>
    %1 = vector.shape_cast %0 : vector<1x256x128xbf16> to vector<256x128xbf16>
    %c0_2 = arith.constant 0 : index
    %c0_3 = arith.constant 0 : index
    %2 = vector.load %arg3[%c0_2, %c0_3] : memref<128x128xbf16, #tpu.memory_space<vmem>>, vector<128x128xbf16>
    %cst = arith.constant dense<0.000000e+00> : vector<256x128xf32>
    %3 = tpu.matmul %1, %2, %cst {dimension_numbers = #tpu.dot_dimension_numbers<[1], [0], [0], [1], [0, 0, 1, 1], [], []>} : vector<256x128xbf16>, vector<128x128xbf16>, vector<256x128xf32> -> vector<256x128xf32>
    %c0_4 = arith.constant 0 : index
    %c0_5 = arith.constant 0 : index
    %4 = vector.load %arg4[%c0_4, %c0_5] : memref<1x128xf32, #tpu.memory_space<vmem>>, vector<1x128xf32>
    %5 = vector.broadcast %4 : vector<1x128xf32> to vector<256x128xf32>
    %6 = arith.addf %3, %5 : vector<256x128xf32>
    %c0_6 = arith.constant 0 : index
    %c0_7 = arith.constant 0 : index
    %c0_8 = arith.constant 0 : index
    %7 = vector.load %arg5[%c0_6, %c0_7, %c0_8] : memref<1x256x128xf32, #tpu.memory_space<vmem>>, vector<1x256x128xf32>
    %8 = vector.shape_cast %7 : vector<1x256x128xf32> to vector<256x128xf32>
    %9 = vector.shape_cast %6 : vector<256x128xf32> to vector<1x256x128xf32>
    tpu.vector_store %arg5[%c0_6, %c0_7, %c0_8], %9 {strides = array<i32>} : memref<1x256x128xf32, #tpu.memory_space<vmem>>, vector<1x256x128xf32>,
    return
  }
  func.func @transform_0(%arg0: i32, %arg1: i32) -> (i32, i32, i32) {
    %c0_i32 = arith.constant 0 : i32
    %c0_i32_0 = arith.constant 0 : i32
    return %arg0, %arg1, %c0_i32 : i32, i32, i32
  }
  func.func @transform_1(%arg0: i32, %arg1: i32) -> (i32, i32) {
    %c0_i32 = arith.constant 0 : i32
    %c0_i32_0 = arith.constant 0 : i32
    %c0_i32_1 = arith.constant 0 : i32
    return %c0_i32, %c0_i32_0 : i32, i32
  }
  func.func @transform_2(%arg0: i32, %arg1: i32) -> (i32, i32) {
    %c0_i32 = arith.constant 0 : i32
    %c0_i32_0 = arith.constant 0 : i32
    %c0_i32_1 = arith.constant 0 : i32
    return %c0_i32, %c0_i32_0 : i32, i32
  }
  func.func @transform_3(%arg0: i32, %arg1: i32) -> (i32, i32, i32) {
    %c0_i32 = arith.constant 0 : i32
    %c0_i32_0 = arith.constant 0 : i32
    return %arg0, %arg1, %c0_i32 : i32, i32, i32
  }
}

</mosaic_0001>

<bundles_post_ra>
// kernel: tpu_custom_call.1
= control target key start
LH: loop header
LB: loop body
LE: loop exit
PB: predicated region body
PF: predicated region fallthrough
CT: control target
= control target key end

     0   :  { %8 = vsyncpa [#allocation3], 0  ;;  %s1408_s0 = inlined_call_operand.hbm [shape: bf16[2,256,128], index: 0, kind: input, shape index: {}]   ;;  %s1409_s1 = inlined_call_operand.hbm [shape: bf16[128,128], index: 1, kind: input, shape index: {}]   ;;  %s1410_s2 = inlined_call_operand.vmem [shape: f32[1,128], index: 2, kind: input, shape index: {}]   ;;  %s1411_s3 = inlined_call_operand.hbm [shape: f32[2,256,128], index: 3, kind: output, shape index: {}]  }
   0x1   :  { %10 = vsyncpa [#allocation3 + $0x1], 0 }
   0x2   :  { %11 = vsyncpa [#allocation6], 0 }
   0x3   :  { %12 = vsyncpa [#allocation4], 0 }
   0x4   :  { %14 = vsyncpa [#allocation4 + $0x1], 0  ;;  %s1130_s12 = smov 0   ;;  %s1132_s13 = smov 0  }
   0x5   :  { %s1134_s14 = smov 0   ;;  %s1136_s15 = smov 0  }
   0x6   :  { %s1138_s16 = smov 0   ;;  %s1140_s17 = smov 0  }
   0x7 LB: > { %s730_s18 = sadd.s32 4294967295, %s1101_s17   ;;  %s731_s19 = sadd.s32 4294967294, %s1101_s17   ;;  %s1101_s17 = sphi %s1140_s17, %s20_s17   ;;  %s1097_s16 = sphi %s1138_s16, %s1433_s16   ;;  %s1093_s15 = sphi %s1136_s15, %s1432_s15   ;;  %s1089_s14 = sphi %s1134_s14, %s1431_s14   ;;  %s1085_s13 = sphi %s1132_s13, %s1430_s13   ;;  %s1081_s12 = sphi %s1130_s12, %s1429_s12  }
   0x8   : > { %p54_p0 = scmp.ne.s32.totalorder %s1085_s13, %s1081_s12  ;;  %p1164_p1 = scmp.eq.s32.totalorder %s730_s18, 0 }
   0x9   : > { %p1168_p2 = scmp.eq.s32.totalorder %s730_s18, 1  ;;  %p128_p3 = scmp.eq.s32.totalorder %s731_s19, 1 }
   0xa   : > { %p1174_p4 = por %p1164_p1, %p54_p0  ;;  %p732_p5 = scmp.ge.s32.totalorder %s1101_s17, 1 }
   0xb   : > { %p1179_p6 = por %p128_p3, %p54_p0  ;;  %p135_p7 = scmp.lt.s32.totalorder %s1101_s17, 3 }
   0xc   : > { %s1417_s22 = scalar_select %p1174_p4, 1, 0 }
   0xd   : > { %s1418_s23 = scalar_select %p1179_p6, 1, 0 }
   0xe   : > { %p1184_p8 = pnand %p732_p5, %p135_p7  ;;  %s1103_s25 = smov [#allocation5]  }
   0xf   : > { %s147_s26 = sshll.u32 %s1103_s25, 4  ;;  %s32_s28 = sadd.s32 1, %s1097_s16  ;;  %s148_s26 = int_to_ptr.vmem [resolvable:$true] %s147_s26 }
  0x10   : > { %p870_p9 = pneg %p1184_p8  ;;  %s974_s29 = scalar_lea.vmem %s148_s26, 1024 }
  0x11   : > { %p975_p13 = scmp.ne.s32.totalorder %s148_s26, %s974_s29  ;;  %p982_p5 = scmp.lt.s32.totalorder %s148_s26, %s148_s26 }
  0x12   : > { %p1193_p11 = pnand %p870_p9, %p1164_p1  ;;  %p983_p7 = scmp.lt.s32.totalorder %s974_s29, %s974_s29 }
  0x14   : > { %p965_p12 = pneg %p1193_p11  ;;  %p984_p6 = por %p983_p7, %p982_p5 }
  0x16   : > { %p977_p0 = pnand %p975_p13, %p965_p12 }
  0x18   : > { %p978_p3 = pneg %p977_p0 }
  0x1a   : > { %p985_p4 = pnand %p984_p6, %p978_p3 }
  0x1c   : > { %988 = shalt.err (!%p985_p4)
}
  0x1d   : > { %s1413_s30 = smov 64   ;;  %s1414_s4 = smov 4  }
  0x1e   : > { %873 = dma.hbm_to_vmem [thread:$0]  (!%p1193_p11), %s1409_s1, 1024, %s148_s26, [#allocation6], %s1413_s30, %s1413_s30, %s1414_s4  }
  0x1f   : > { %p34_p4 = scmp.ge.s32.totalorder %s32_s28, 2  ;;  %s41_s7 = sadd.s32 1, %s1089_s14 }
  0x20   : > { %p48_p6 = scmp.ne.s32.totalorder %s1089_s14, %s1085_s13  ;;  %p49_p9 = scmp.eq.s32.totalorder %s1101_s17, 0 }
  0x21   : > { %s1435_s28 = smov (%p34_p4, %s32_s28), 0  ;;  %p883_p0 = scmp.lt.s32.totalorder %s1101_s17, 2 }
  0x22   : > { %p1214_p12 = por %p49_p9, %p48_p6  ;;  %p1220_p13 = por %p1168_p2, %p48_p6 }
  0x23   : > { %s36_s10 = ssub.s32 %s1097_s16, %s1435_s28  ;;  %s164_s11 = sand.u32 1, %s1089_s14  }
  0x24   : > { %p39_p11 = scmp.eq.s32.totalorder %s36_s10, 0  ;;  %s735_s18 = sshll.u32 %s164_s11, 7 }
  0x25   : > { %s772_s25 = sshll.u32 %s1097_s16, 11  ;;  %s168_s5 = scalar_lea.vmem [#allocation2], %s735_s18 }
  0x26   : > { %s1229_s19 = scalar_select %p39_p11, %s1089_s14, %s41_s7  }
  0x27   : > { %s176_s29 = scalar_lea.hbm %s1408_s0, %s772_s25  ;;  %s177_s6 = sshll.u32 %s168_s5, 4  ;;  %s178_s6 = int_to_ptr.vmem [resolvable:$true] %s177_s6 }
  0x28   : > { %p1237_p2 = pnand %p883_p0, %p1214_p12  ;;  %s165_s30 = scalar_lea.sflag [#allocation3], %s164_s11 }
  0x29   : > { %s1002_s10 = scalar_lea.vmem %s178_s6, 2048  ;;  %s1106_s7 = smov [#allocation2]  }
  0x2a   : > { %p991_p3 = pneg %p1237_p2  ;;  %p1003_p5 = scmp.ne.s32.totalorder %s178_s6, %s1002_s10 }
  0x2b   : > { %s1007_s4 = sshll.u32 %s1106_s7, 4  ;;  %s1008_s4 = int_to_ptr.vmem [resolvable:$false] %s1007_s4 }
  0x2c   : > { %p1005_p7 = pnand %p1003_p5, %p991_p3  ;;  %s1009_s25 = scalar_lea.vmem %s1008_s4, 4096 }
  0x2d   : > { %p1010_p6 = scmp.lt.s32.totalorder %s178_s6, %s1008_s4  ;;  %p1011_p9 = scmp.lt.s32.totalorder %s1009_s25, %s1002_s10 }
  0x2e   : > { %p1006_p4 = pneg %p1005_p7 }
  0x2f   : > { %p1012_p11 = por %p1011_p9, %p1010_p6 }
  0x31   : > { %p1013_p10 = pnand %p1012_p11, %p1006_p4 }
  0x33   : > { %1016 = shalt.err (!%p1013_p10)
}
  0x34   : > { %s1424_s8 = smov 4   ;;  %s1425_s18 = smov 64  }
  0x35   : > { %877 = dma.hbm_to_vmem [thread:$0]  (!%p1237_p2), %s176_s29, 2048, %s178_s6, %s165_s30, %s1425_s18, %s1425_s18, %s1424_s8  }
  0x36   : > { %189 = sbr.rel (%p1184_p8) target bundleno = 334 (0x14e), region = 32  ;;  %s1251_s11 = sand.u32 (!%p1184_p8), 1, %s1085_s13  }
  0x37   : > { %s739_s4 = sshll.u32 (!%p1184_p8), %s1251_s11, 7  ;;  %s192_s26 = scalar_lea.sflag (!%p1184_p8), [#allocation3], %s1251_s11 }
  0x38   : > { %s1255_s27 = scalar_lea.vmem (!%p1184_p8), [#allocation2], %s739_s4  ;;  %p1426_p10 = scmp.ne.s32.totalorder (!%p1184_p8), %s1417_s22, 0 }
  0x3b   : > { %1068 = dma.done.wait (%p1426_p10), %s192_s26, 2048  }
  0x3c   : > { %1070 = vsyncadd (%p1426_p10), %s192_s26, 4294965248 }
  0x3d   : > { %1072 = dma.done.wait (%p1164_p1), [#allocation6], 1024  }
  0x3e   : > { %1074 = vsyncadd (%p1164_p1), [#allocation6], 4294966272  ;;  %v939_v0 = vld [vmem:[#allocation5 + $0x38] sm:$0xff]   ;;  %v940_v1 = vld [vmem:[#allocation5 + $0x30] sm:$0xff]   ;;  %s741_s20 = sshll.u32 %s1251_s11, 8  ;;  %s773_s29 = sshll.u32 %s1093_s15, 12 }
  0x3f   : > { %798 = vmatprep.subr.bf16.mxu0 %v939_v0  ;;  %846 = vmatprep.subr.bf16.mxu1 %v939_v0  ;;  %v941_v2 = vld [vmem:[#allocation5 + $0x28] sm:$0xff]   ;;  %v942_v3 = vld [vmem:[#allocation5 + $0x20] sm:$0xff]   ;;  %v943_v6 = vld [vmem:[#allocation5 + $0x18] sm:$0xff]   ;;  %s1289_s30 = scalar_lea.vmem [#allocation7], %s741_s20  ;;  %s1352_s10 = scalar_lea.hbm %s1411_s3, %s773_s29 }
  0x40   : > { %799 = vmatpush3.bf16.msra.mxu0 %v939_v0  ;;  %854 = vmatpush3.bf16.msra.mxu1 %v939_v0  ;;  %v947_v4 = vld [vmem:[%s1255_s27] sm:$0xff]   ;;  %v944_v7 = vld [vmem:[#allocation5 + $0x10] sm:$0xff]   ;;  %v945_v8 = vld [vmem:[#allocation5 + $0x8] sm:$0xff]   ;;  %s633_s5 = sshll.u32 %s1289_s30, 4  ;;  %s618_s15 = scalar_lea.sflag [#allocation4], %s1251_s11  ;;  %s1354_s5 = int_to_ptr.vmem [resolvable:$true] %s633_s5 }
  0x41   : > { %800 = vmatprep.subr.bf16.mxu0 %v940_v1  ;;  %847 = vmatprep.subr.bf16.mxu1 %v940_v1  ;;  %v948_v5 = vld [vmem:[%s1255_s27 + $0x40] sm:$0xff]   ;;  %v949_v10 = vld [vmem:[%s1255_s27 + $0x8] sm:$0xff]   ;;  %v951_v12 = vld [vmem:[%s1255_s27 + $0x10] sm:$0xff]   ;;  %s1017_s7 = scalar_lea.vmem %s1354_s5, 4096  ;;  %s1107_s25 = smov [#allocation7]  }
  0x42   : > { %814 = vmatprep.mubr.bf16.mxu0 %v947_v4  ;;  %830 = vmatprep.mubr.bf16.mxu1 %v948_v5  ;;  %v946_v9 = vld [vmem:[#allocation5] sm:$0xff]   ;;  %v950_v11 = vld [vmem:[%s1255_s27 + $0x48] sm:$0xff]   ;;  %v952_v13 = vld [vmem:[%s1255_s27 + $0x50] sm:$0xff]   ;;  %p1018_p1 = scmp.ne.s32.totalorder %s1354_s5, %s1017_s7  ;;  %s1021_s8 = sshll.u32 %s1107_s25, 4  ;;  %s1022_s8 = int_to_ptr.vmem [resolvable:$false] %s1021_s8 }
  0x43   : > { %v953_v14 = vld [vmem:[%s1255_s27 + $0x18] sm:$0xff]   ;;  %v955_v16 = vld [vmem:[%s1255_s27 + $0x20] sm:$0xff]   ;;  %v957_v18 = vld [vmem:[%s1255_s27 + $0x28] sm:$0xff]   ;;  %s1023_s18 = scalar_lea.vmem %s1022_s8, 8192  ;;  %p1024_p0 = scmp.lt.s32.totalorder %s1354_s5, %s1022_s8 }
  0x44   : > { %801 = vmatpush3.bf16.msra.mxu0 %v940_v1  ;;  %855 = vmatpush3.bf16.msra.mxu1 %v940_v1  ;;  %v954_v15 = vld [vmem:[%s1255_s27 + $0x58] sm:$0xff]   ;;  %v956_v17 = vld [vmem:[%s1255_s27 + $0x60] sm:$0xff]   ;;  %v958_v19 = vld [vmem:[%s1255_s27 + $0x68] sm:$0xff]   ;;  %p1019_p8 = pnand %p1018_p1, %p1220_p13  ;;  %p1025_p2 = scmp.lt.s32.totalorder %s1023_s18, %s1017_s7 }
  0x45   : > { %802 = vmatprep.subr.bf16.mxu0 %v941_v2  ;;  %848 = vmatprep.subr.bf16.mxu1 %v941_v2  ;;  %v959_v20 = vld [vmem:[%s1255_s27 + $0x30] sm:$0xff]   ;;  %v961_v22 = vld [vmem:[%s1255_s27 + $0x38] sm:$0xff]   ;;  %v1285_v24 = vld [vmem:[%s1410_s2] ss:$0 sm:$0xff] }
  0x46   : > { %v960_v21 = vld [vmem:[%s1255_s27 + $0x70] sm:$0xff]   ;;  %v962_v23 = vld [vmem:[%s1255_s27 + $0x78] sm:$0xff]   ;;  %p1020_p12 = pneg %p1019_p8  ;;  %p1026_p3 = por %p1025_p2, %p1024_p0 }
  0x48   : > { %803 = vmatpush3.bf16.msra.mxu0 %v941_v2  ;;  %856 = vmatpush3.bf16.msra.mxu1 %v941_v2  ;;  %p1027_p5 = pnand %p1026_p3, %p1020_p12 }
  0x49   : > { %804 = vmatprep.subr.bf16.mxu0 %v942_v3  ;;  %849 = vmatprep.subr.bf16.mxu1 %v942_v3 }
  0x4c   : > { %805 = vmatpush3.bf16.msra.mxu0 %v942_v3  ;;  %857 = vmatpush3.bf16.msra.mxu1 %v942_v3 }
  0x4d   : > { %806 = vmatprep.subr.bf16.mxu0 %v943_v6  ;;  %850 = vmatprep.subr.bf16.mxu1 %v943_v6 }
  0x50   : > { %807 = vmatpush3.bf16.msra.mxu0 %v943_v6  ;;  %858 = vmatpush3.bf16.msra.mxu1 %v943_v6 }
  0x51   : > { %808 = vmatprep.subr.bf16.mxu0 %v944_v7  ;;  %851 = vmatprep.subr.bf16.mxu1 %v944_v7 }
  0x54   : > { %809 = vmatpush3.bf16.msra.mxu0 %v944_v7  ;;  %859 = vmatpush3.bf16.msra.mxu1 %v944_v7 }
  0x55   : > { %810 = vmatprep.subr.bf16.mxu0 %v945_v8  ;;  %852 = vmatprep.subr.bf16.mxu1 %v945_v8 }
  0x58   : > { %811 = vmatpush3.bf16.msra.mxu0 %v945_v8  ;;  %860 = vmatpush3.bf16.msra.mxu1 %v945_v8 }
  0x59   : > { %812 = vmatprep.subr.bf16.mxu0 %v946_v9  ;;  %853 = vmatprep.subr.bf16.mxu1 %v946_v9 }
  0x5c   : > { %813 = vmatpush3.bf16.msra.mxu0 %v946_v9  ;;  %861 = vmatpush3.bf16.msra.mxu1 %v946_v9 }
  0x5f   : > { %815 = vmatmul.mubr.bf16.vlgmr.msra.gmra.mxu0 %v949_v10  ;;  %831 = vmatmul.mubr.bf16.vlgmr.msra.gmra.mxu1 %v950_v11 }
  0x60   : > { %818 = vmatprep.mubr.bf16.mxu0 %v951_v12  ;;  %834 = vmatprep.mubr.bf16.mxu1 %v952_v13 }
  0x67   : > { %819 = vmatmul.mubr.bf16.gmra.mxu0 %v953_v14  ;;  %835 = vmatmul.mubr.bf16.gmra.mxu1 %v954_v15 }
  0x68   : > { %822 = vmatprep.mubr.bf16.mxu0 %v955_v16  ;;  %838 = vmatprep.mubr.bf16.mxu1 %v956_v17 }
  0x6f   : > { %823 = vmatmul.mubr.bf16.gmra.mxu0 %v957_v18  ;;  %839 = vmatmul.mubr.bf16.gmra.mxu1 %v958_v19 }
  0x70   : > { %826 = vmatprep.mubr.bf16.mxu0 %v959_v20  ;;  %842 = vmatprep.mubr.bf16.mxu1 %v960_v21 }
  0x77   : > { %827 = vmatmul.mubr.bf16.gmra.mxu0 %v961_v22  ;;  %843 = vmatmul.mubr.bf16.gmra.mxu1 %v962_v23 }
 0x11f   : > { %v816_v25 = vpop.f32.mrf.mxu0  ;;  %v832_v26 = vpop.f32.mrf.mxu1 }
 0x120   : > { %v467_v27 = vadd.f32 %v816_v25, %v1285_v24  ;;  %v531_v28 = vadd.f32 %v832_v26, %v1285_v24 }
 0x121   : > { %v458_v29 = vpop.f32.mrf.mxu0  ;;  %v522_v30 = vpop.f32.mrf.mxu1 }
 0x122   : > { %587 = vst [vmem:[%s1289_s30 + $0x10] sm:$0xff] %v467_v27  ;;  %603 = vst [vmem:[%s1289_s30 + $0x90] sm:$0xff] %v531_v28  ;;  %v459_v31 = vadd.f32 %v1285_v24, %v458_v29  ;;  %v523_v32 = vadd.f32 %v1285_v24, %v522_v30 }
 0x123   : > { %v817_v33 = vpop.f32.mrf.mxu0  ;;  %v833_v34 = vpop.f32.mrf.mxu1 }
 0x124   : > { %585 = vst [vmem:[%s1289_s30] sm:$0xff] %v459_v31  ;;  %601 = vst [vmem:[%s1289_s30 + $0x80] sm:$0xff] %v523_v32  ;;  %v470_v35 = vadd.f32 %v817_v33, %v1285_v24  ;;  %v534_v36 = vadd.f32 %v833_v34, %v1285_v24 }
 0x125   : > { %v461_v37 = vpop.f32.mrf.mxu0  ;;  %v525_v38 = vpop.f32.mrf.mxu1 }
 0x126   : > { %588 = vst [vmem:[%s1289_s30 + $0x18] sm:$0xff] %v470_v35  ;;  %604 = vst [vmem:[%s1289_s30 + $0x98] sm:$0xff] %v534_v36  ;;  %v462_v39 = vadd.f32 %v1285_v24, %v461_v37  ;;  %v526_v40 = vadd.f32 %v1285_v24, %v525_v38 }
 0x127   : > { %v820_v41 = vpop.f32.mrf.mxu0  ;;  %v836_v42 = vpop.f32.mrf.mxu1 }
 0x128   : > { %586 = vst [vmem:[%s1289_s30 + $0x8] sm:$0xff] %v462_v39  ;;  %602 = vst [vmem:[%s1289_s30 + $0x88] sm:$0xff] %v526_v40  ;;  %v483_v43 = vadd.f32 %v820_v41, %v1285_v24  ;;  %v547_v44 = vadd.f32 %v836_v42, %v1285_v24 }
 0x129   : > { %v474_v45 = vpop.f32.mrf.mxu0  ;;  %v538_v46 = vpop.f32.mrf.mxu1 }
 0x12a   : > { %591 = vst [vmem:[%s1289_s30 + $0x30] sm:$0xff] %v483_v43  ;;  %607 = vst [vmem:[%s1289_s30 + $0xb0] sm:$0xff] %v547_v44  ;;  %v475_v47 = vadd.f32 %v1285_v24, %v474_v45  ;;  %v539_v48 = vadd.f32 %v1285_v24, %v538_v46 }
 0x12b   : > { %v821_v49 = vpop.f32.mrf.mxu0  ;;  %v837_v50 = vpop.f32.mrf.mxu1 }
 0x12c   : > { %589 = vst [vmem:[%s1289_s30 + $0x20] sm:$0xff] %v475_v47  ;;  %605 = vst [vmem:[%s1289_s30 + $0xa0] sm:$0xff] %v539_v48  ;;  %v486_v51 = vadd.f32 %v821_v49, %v1285_v24  ;;  %v550_v52 = vadd.f32 %v837_v50, %v1285_v24 }
 0x12d   : > { %v477_v53 = vpop.f32.mrf.mxu0  ;;  %v541_v54 = vpop.f32.mrf.mxu1 }
 0x12e   : > { %592 = vst [vmem:[%s1289_s30 + $0x38] sm:$0xff] %v486_v51  ;;  %608 = vst [vmem:[%s1289_s30 + $0xb8] sm:$0xff] %v550_v52  ;;  %v478_v55 = vadd.f32 %v1285_v24, %v477_v53  ;;  %v542_v56 = vadd.f32 %v1285_v24, %v541_v54 }
 0x12f   : > { %v824_v57 = vpop.f32.mrf.mxu0  ;;  %v840_v58 = vpop.f32.mrf.mxu1 }
 0x130   : > { %590 = vst [vmem:[%s1289_s30 + $0x28] sm:$0xff] %v478_v55  ;;  %606 = vst [vmem:[%s1289_s30 + $0xa8] sm:$0xff] %v542_v56  ;;  %v499_v59 = vadd.f32 %v824_v57, %v1285_v24  ;;  %v563_v60 = vadd.f32 %v840_v58, %v1285_v24 }
 0x131   : > { %v490_v61 = vpop.f32.mrf.mxu0  ;;  %v554_v62 = vpop.f32.mrf.mxu1 }
 0x132   : > { %595 = vst [vmem:[%s1289_s30 + $0x50] sm:$0xff] %v499_v59  ;;  %611 = vst [vmem:[%s1289_s30 + $0xd0] sm:$0xff] %v563_v60  ;;  %v491_v63 = vadd.f32 %v1285_v24, %v490_v61  ;;  %v555_v0 = vadd.f32 %v1285_v24, %v554_v62 }
 0x133   : > { %v825_v1 = vpop.f32.mrf.mxu0  ;;  %v841_v2 = vpop.f32.mrf.mxu1 }
 0x134   : > { %593 = vst [vmem:[%s1289_s30 + $0x40] sm:$0xff] %v491_v63  ;;  %609 = vst [vmem:[%s1289_s30 + $0xc0] sm:$0xff] %v555_v0  ;;  %v502_v3 = vadd.f32 %v825_v1, %v1285_v24  ;;  %v566_v4 = vadd.f32 %v841_v2, %v1285_v24 }
 0x135   : > { %v493_v5 = vpop.f32.mrf.mxu0  ;;  %v557_v6 = vpop.f32.mrf.mxu1 }
 0x136   : > { %596 = vst [vmem:[%s1289_s30 + $0x58] sm:$0xff] %v502_v3  ;;  %612 = vst [vmem:[%s1289_s30 + $0xd8] sm:$0xff] %v566_v4  ;;  %v494_v7 = vadd.f32 %v1285_v24, %v493_v5  ;;  %v558_v8 = vadd.f32 %v1285_v24, %v557_v6 }
 0x137   : > { %v828_v9 = vpop.f32.mrf.mxu0  ;;  %v844_v10 = vpop.f32.mrf.mxu1 }
 0x138   : > { %594 = vst [vmem:[%s1289_s30 + $0x48] sm:$0xff] %v494_v7  ;;  %610 = vst [vmem:[%s1289_s30 + $0xc8] sm:$0xff] %v558_v8  ;;  %v515_v11 = vadd.f32 %v828_v9, %v1285_v24  ;;  %v579_v12 = vadd.f32 %v844_v10, %v1285_v24 }
 0x139   : > { %v506_v13 = vpop.f32.mrf.mxu0  ;;  %v570_v14 = vpop.f32.mrf.mxu1 }
 0x13a   : > { %599 = vst [vmem:[%s1289_s30 + $0x70] sm:$0xff] %v515_v11  ;;  %615 = vst [vmem:[%s1289_s30 + $0xf0] sm:$0xff] %v579_v12  ;;  %v507_v15 = vadd.f32 %v1285_v24, %v506_v13  ;;  %v571_v16 = vadd.f32 %v1285_v24, %v570_v14 }
 0x13b   : > { %v829_v17 = vpop.f32.mrf.mxu0  ;;  %v845_v18 = vpop.f32.mrf.mxu1 }
 0x13c   : > { %597 = vst [vmem:[%s1289_s30 + $0x60] sm:$0xff] %v507_v15  ;;  %613 = vst [vmem:[%s1289_s30 + $0xe0] sm:$0xff] %v571_v16  ;;  %v518_v19 = vadd.f32 %v829_v17, %v1285_v24  ;;  %v582_v20 = vadd.f32 %v845_v18, %v1285_v24 }
 0x13d   : > { %v509_v21 = vpop.f32.mrf.mxu0  ;;  %v573_v22 = vpop.f32.mrf.mxu1 }
 0x13e   : > { %600 = vst [vmem:[%s1289_s30 + $0x78] sm:$0xff] %v518_v19  ;;  %616 = vst [vmem:[%s1289_s30 + $0xf8] sm:$0xff] %v582_v20  ;;  %v510_v23 = vadd.f32 %v1285_v24, %v509_v21  ;;  %v574_v25 = vadd.f32 %v1285_v24, %v573_v22 }
 0x140   : > { %598 = vst [vmem:[%s1289_s30 + $0x68] sm:$0xff] %v510_v23  ;;  %614 = vst [vmem:[%s1289_s30 + $0xe8] sm:$0xff] %v574_v25 }
 0x141   : > { %1030 = shalt.err (!%p1027_p5)
}
 0x142   : > { %s1031_s4 = scalar_lea.hbm %s1352_s10, 4096  ;;  %s1035_s20 = scalar_lea.hbm %s1411_s3, 8192 }
 0x143   : > { %p1032_p7 = scmp.ne.s32.totalorder %s1352_s10, %s1031_s4  ;;  %p1036_p9 = scmp.lt.s32.totalorder %s1352_s10, %s1411_s3 }
 0x144   : > { %p1037_p11 = scmp.lt.s32.totalorder %s1035_s20, %s1031_s4 }
 0x145   : > { %p1033_p4 = pnand %p1032_p7, %p1220_p13 }
 0x146   : > { %p1038_p10 = por %p1037_p11, %p1036_p9 }
 0x147   : > { %p1034_p6 = pneg %p1033_p4 }
 0x149   : > { %p1039_p1 = pnand %p1038_p10, %p1034_p6 }
 0x14b   : > { %1042 = shalt.err (!%p1039_p1)
}
 0x14c   : > { %s1108_s30 = smov 128   ;;  %s1109_s29 = smov 8  }
 0x14d   : > { %868 = dma.vmem_to_hbm [thread:$0]  (%p1220_p13), %s1354_s5, 4096, %s1352_s10, %s618_s15, %s1108_s30, %s1108_s30, %s1109_s29  }
 0x14e PF: > { %s648_s6 = sand.u32 1, %s1081_s12   ;;  %p1427_p8 = scmp.ne.s32.totalorder %s1418_s23, 0 }
 0x14f   : > { %p1428_p12 = scmp.ge.s32.totalorder %s1101_s17, 2  ;;  %s649_s21 = scalar_lea.sflag [#allocation4], %s648_s6 }
 0x151   : > { %p879_p0 = pnand %p1428_p12, %p1427_p8 }
 0x153   : > { %p880_p2 = pneg %p879_p0 }
 0x155   : > { %1076 = dma.done.wait (%p880_p2), %s649_s21, 4096  }
 0x156   : > { %1078 = vsyncadd (%p880_p2), %s649_s21, 4294963200  ;;  %s20_s17 = sadd.s32 1, %s1101_s17   ;;  %s1429_s12 = smov %s1085_s13 }
 0x157   : > { %p17_p3 = scmp.ge.s32.totalorder %s20_s17, 4   ;;  %s1430_s13 = smov %s1089_s14 }
 0x158   : > { %s1431_s14 = smov %s1229_s19  ;;  %s1432_s15 = smov %s1097_s16 }
 0x159   : > { %s1433_s16 = smov %s1435_s28  ;;  %19 = sbr.rel (!%p17_p3) target bundleno = 7 (0x7), region = 81 }
 0x15e   :  { %654 = vsyncpa [#allocation3], 1 }
 0x15f   :  { %656 = vsyncpa [#allocation3 + $0x1], 1 }
 0x160   :  { %657 = vsyncpa [#allocation6], 1 }
 0x161   :  { %658 = vsyncpa [#allocation4], 1 }
 0x162   :  { %660 = vsyncpa [#allocation4 + $0x1], 1 }

</bundles_post_ra>
